<compile_context>
chip_gen: v6e
topology: v6e:2x2x1
jax: 0.10.0
libtpu: 0.0.40
codegen_flags: <defaults>
</compile_context>

<pallas_src>
import functools

import jax
import jax.numpy as jnp
from jax.experimental import pallas as pl
from jax.experimental.pallas import tpu as pltpu

LANE = 128  # TPU lane width: nodes are packed 128-per-lane-row.


def _cdiv(a, b):
    return -(-a // b)


def linear_cohesion_kernel(x_ref, beta_ref, alpha_ref, out_ref):
    # x_ref:     (tb, 128, F)   -- tb * 128 nodes, F features
    # beta_ref:  (1, 1, F)      -- VMEM-resident parameter
    # alpha_ref: (tb, 128)      -- per-node bias, lane-dense
    # out_ref:   (tb, 128)      -- lane-dense result
    prod = x_ref[...] * beta_ref[...]                      # VPU broadcast-multiply
    out_ref[...] = jnp.sum(prod, axis=-1) + alpha_ref[...]  # XLU reduce over F


@functools.partial(jax.jit, static_argnames=("tm",))
def linear_cohesion_forward(x, alpha, beta, *, tm=2048):
    """out[n, 0] = sum_f x[n, f] * beta[f, 0] + alpha[n, 0]."""
    n, f = x.shape
    assert beta.shape == (f, 1)
    assert alpha.shape == (n, 1)
    assert tm % LANE == 0 and tm > 0

    if x.dtype != jnp.float32:
        x = x.astype(jnp.float32)
    alpha = alpha.astype(jnp.float32)
    beta = beta.astype(jnp.float32)

    # Tile selection: r = number of 128-node lane rows; tb = lane rows per
    # grid step.  Keep >= 2 grid steps when possible so v7x's two TensorCores
    # both get work from the "parallel" axis (v5e/v6e: single TC, harmless).
    r = _cdiv(n, LANE)
    tb = min(tm // LANE, r)
    if tb == r and r > 1:
        tb = _cdiv(r, 2)
    grid_n = _cdiv(r, tb)
    n_pad = grid_n * tb * LANE

    # Pad the node axis only if needed (skipped entirely when tiles divide n,
    # so no extra HBM pass over x in the common case).
    if n_pad != n:
        x = jnp.pad(x, ((0, n_pad - n), (0, 0)))
        alpha = jnp.pad(alpha, ((0, n_pad - n), (0, 0)))

    # Free (contiguous) HBM reshapes into lane-dense views.
    x4 = x.reshape(grid_n, tb, LANE, f)
    alpha3 = alpha.reshape(grid_n, tb, LANE)
    beta3 = beta.reshape(1, 1, f)

    out3 = pl.pallas_call(
        linear_cohesion_kernel,
        out_shape=jax.ShapeDtypeStruct((grid_n, tb, LANE), jnp.float32),
        grid=(grid_n,),
        in_specs=[
            # x: one (tb, 128, F) node-slab per step (leading grid dim squeezed)
            pl.BlockSpec((None, tb, LANE, f), lambda i: (i, 0, 0, 0)),
            # beta: tiny, VMEM-resident across the whole grid
            pl.BlockSpec((1, 1, f), lambda i: (0, 0, 0)),
            # alpha: lane-dense per-node bias, tiled with the rows
            pl.BlockSpec((None, tb, LANE), lambda i: (i, 0, 0)),
        ],
        out_specs=pl.BlockSpec((None, tb, LANE), lambda i: (i, 0, 0)),
        compiler_params=pltpu.CompilerParams(
            dimension_semantics=("parallel",),  # megacore: split row tiles
            # Per-step footprint: ~2 * tb * 64 KiB (x, lane-padded in VMEM,
            # double-buffered) + ~4 * tb * 0.5 KiB (alpha/out) — a few MiB at
            # tb=16.  Explicit limit keeps v5e (16 MiB scoped default) happy
            # and stays well under v7x's 64 MiB physical VMEM.
            vmem_limit_bytes=32 * 1024 * 1024,
        ),
    )(x4, beta3, alpha3)

    if n_pad == n:
        return out3.reshape(n, 1)
    return out3.reshape(n_pad)[:n].reshape(n, 1)


if __name__ == "__main__":
    # Small shapes consistent with the module; NUM_NODES deliberately not a
    # multiple of 128 to exercise padding and a multi-step grid.
    NUM_NODES = 300
    NUM_FEATURES = 32

    key = jax.random.PRNGKey(0)
    k_x, k_a, k_b = jax.random.split(key, 3)

    x = jax.random.normal(k_x, (NUM_NODES, NUM_FEATURES), jnp.float32)
    # alpha = Parameter(normal(0, 1, (num_nodes, 1)))
    alpha = jax.random.normal(k_a, (NUM_NODES, 1), jnp.float32)
    # beta = Parameter(normal(0, 1, (num_features, 1)))
    beta = jax.random.normal(k_b, (NUM_FEATURES, 1), jnp.float32)

    out = linear_cohesion_forward(x, alpha, beta)
    jax.block_until_ready(out)

    ref = jnp.dot(x, beta, precision=jax.lax.Precision.HIGHEST) + alpha
    assert out.shape == (NUM_NODES, 1)
    assert jnp.allclose(out, ref, atol=1e-5, rtol=1e-5)
    print("KERNEL_OK")
</pallas_src>

<mosaic_0001>
module attributes {stable_mosaic.version = 11 : i64} {
  func.func @linear_cohesion_kernel(%arg0: i32, %arg1: memref<1x2x128x32xf32, #tpu.memory_space<vmem>>, %arg2: memref<1x1x32xf32, #tpu.memory_space<vmem>>, %arg3: memref<1x2x128xf32, #tpu.memory_space<vmem>>, %arg4: memref<1x2x128xf32, #tpu.memory_space<vmem>>) attributes {dimension_semantics = [#tpu.dimension_semantics<parallel>], iteration_bounds = array<i64: 2>, scalar_prefetch = 0 : i64, scratch_operands = 0 : i64, tpu.core_type = #tpu.core_type<tc>, window_params = [{transform_indices = @transform_0, window_bounds = array<i64: 1, 2, 128, 32>}, {pipeline_mode = #tpu.pipeline_mode<synchronous>, transform_indices = @transform_1, window_bounds = array<i64: 1, 1, 32>}, {transform_indices = @transform_2, window_bounds = array<i64: 1, 2, 128>}, {transform_indices = @transform_3, window_bounds = array<i64: 1, 2, 128>}]} {
    %c0 = arith.constant 0 : index
    %c0_0 = arith.constant 0 : index
    %c0_1 = arith.constant 0 : index
    %c0_2 = arith.constant 0 : index
    %0 = vector.load %arg1[%c0, %c0_0, %c0_1, %c0_2] : memref<1x2x128x32xf32, #tpu.memory_space<vmem>>, vector<1x2x128x32xf32>
    %1 = vector.shape_cast %0 : vector<1x2x128x32xf32> to vector<2x128x32xf32>
    %c0_3 = arith.constant 0 : index
    %c0_4 = arith.constant 0 : index
    %c0_5 = arith.constant 0 : index
    %2 = vector.load %arg2[%c0_3, %c0_4, %c0_5] : memref<1x1x32xf32, #tpu.memory_space<vmem>>, vector<1x1x32xf32>
    %3 = vector.broadcast %2 : vector<1x1x32xf32> to vector<2x128x32xf32>
    %4 = arith.mulf %1, %3 : vector<2x128x32xf32>
    %cst = arith.constant dense<0.000000e+00> : vector<2x128xf32>
    %5 = vector.multi_reduction <add>, %4, %cst [2] : vector<2x128x32xf32> to vector<2x128xf32>
    %c0_6 = arith.constant 0 : index
    %c0_7 = arith.constant 0 : index
    %c0_8 = arith.constant 0 : index
    %6 = vector.load %arg3[%c0_6, %c0_7, %c0_8] : memref<1x2x128xf32, #tpu.memory_space<vmem>>, vector<1x2x128xf32>
    %7 = vector.shape_cast %6 : vector<1x2x128xf32> to vector<2x128xf32>
    %8 = arith.addf %5, %7 : vector<2x128xf32>
    %c0_9 = arith.constant 0 : index
    %c0_10 = arith.constant 0 : index
    %c0_11 = arith.constant 0 : index
    %9 = vector.load %arg4[%c0_9, %c0_10, %c0_11] : memref<1x2x128xf32, #tpu.memory_space<vmem>>, vector<1x2x128xf32>
    %10 = vector.shape_cast %9 : vector<1x2x128xf32> to vector<2x128xf32>
    %11 = vector.shape_cast %8 : vector<2x128xf32> to vector<1x2x128xf32>
    tpu.vector_store %arg4[%c0_9, %c0_10, %c0_11], %11 {strides = array<i32>} : memref<1x2x128xf32, #tpu.memory_space<vmem>>, vector<1x2x128xf32>,
    return
  }
  func.func @transform_0(%arg0: i32) -> (i32, i32, i32, i32) {
    %c0_i32 = arith.constant 0 : i32
    %c0_i32_0 = arith.constant 0 : i32
    %c0_i32_1 = arith.constant 0 : i32
    %c0_i32_2 = arith.constant 0 : i32
    return %arg0, %c0_i32, %c0_i32_0, %c0_i32_1 : i32, i32, i32, i32
  }
  func.func @transform_1(%arg0: i32) -> (i32, i32, i32) {
    %c0_i32 = arith.constant 0 : i32
    %c0_i32_0 = arith.constant 0 : i32
    %c0_i32_1 = arith.constant 0 : i32
    %c0_i32_2 = arith.constant 0 : i32
    return %c0_i32, %c0_i32_0, %c0_i32_1 : i32, i32, i32
  }
  func.func @transform_2(%arg0: i32) -> (i32, i32, i32) {
    %c0_i32 = arith.constant 0 : i32
    %c0_i32_0 = arith.constant 0 : i32
    %c0_i32_1 = arith.constant 0 : i32
    return %arg0, %c0_i32, %c0_i32_0 : i32, i32, i32
  }
  func.func @transform_3(%arg0: i32) -> (i32, i32, i32) {
    %c0_i32 = arith.constant 0 : i32
    %c0_i32_0 = arith.constant 0 : i32
    %c0_i32_1 = arith.constant 0 : i32
    return %arg0, %c0_i32, %c0_i32_0 : i32, i32, i32
  }
}

</mosaic_0001>

<bundles_post_ra>
// kernel: linear_cohesion_forward.1
= control target key start
LH: loop header
LB: loop body
LE: loop exit
PB: predicated region body
PF: predicated region fallthrough
CT: control target
= control target key end

     0   :  { %s994_s12 = smov 0   ;;  %s1272_s0 = inlined_call_operand.vmem [shape: f32[2,2,128,32], index: 0, kind: input, shape index: {}]   ;;  %s1273_s1 = inlined_call_operand.vmem [shape: f32[1,1,32], index: 1, kind: input, shape index: {}]   ;;  %s1274_s2 = inlined_call_operand.vmem [shape: f32[2,2,128], index: 2, kind: input, shape index: {}]   ;;  %s1275_s3 = inlined_call_operand.vmem [shape: f32[2,2,128], index: 3, kind: output, shape index: {}]  }
   0x1 LB: > { %s941_s13 = sadd.s32 4294967295, %s971_s12   ;;  %p945_p0 = scmp.ge.s32.totalorder %s971_s12, 1  ;;  %s971_s12 = sphi %s994_s12, %s13_s12  }
   0x2   : > { %p146_p1 = scmp.lt.s32.totalorder %s971_s12, 3 }
   0x4   : > { %p147_p2 = pnand %p945_p0, %p146_p1 }
   0x5   : > { %p173_p3 = scmp.lt.s32.totalorder (!%p147_p2), %s941_s13, 1 }
   0x6   : > { %150 = sbr.rel (%p147_p2) target bundleno = 423 (0x1a7), region = 32 }
   0xb   : > { %s1277_s13 = smov (!%p173_p3, %s941_s13), 1  ;;  %v1008_v0 = vld [vmem:[%s1273_s1] ss:$0 sm:$0xff]  ;;  %vm257_vm0 = vcmask 261120   ;;  %vm693_vm1 = vcmask 130112   ;;  %vm700_vm2 = vcmask 195712  }
   0xc   : > { %s953_s14 = sshll.u32 %s1277_s13, 8  ;;  %s948_s20 = sshll.u32 %s1277_s13, 1  ;;  %vm707_vm3 = vcmask 261312   ;;  %vm714_vm4 = vcmask 326912   ;;  %vm721_vm5 = vcmask 392512   ;;  %vm728_vm6 = vcmask 458112  }
   0xd   : > { %s1013_s19 = scalar_lea.vmem %s1272_s0, %s953_s14  ;;  %s181_s23 = scalar_lea.vmem %s1274_s2, %s948_s20  ;;  %vm735_vm7 = vcmask 523712   ;;  %vm742_vm8 = vcmask 589312   ;;  %vm749_vm9 = vcmask 654912   ;;  %vm756_vm10 = vcmask 720512  }
   0xe   : > { %v188_v1 = vld [vmem:[%s1013_s19 + $0x10] sm:$0xff]  ;;  %v186_v2 = vld [vmem:[%s1013_s19] sm:$0xff]  ;;  %v189_v3 = vld [vmem:[%s1013_s19 + $0x18] sm:$0xff]  ;;  %vm763_vm11 = vcmask 786112   ;;  %vm770_vm12 = vcmask 851712   ;;  %vm777_vm13 = vcmask 917312   ;;  %s185_s26 = scalar_lea.vmem %s1275_s3, %s948_s20 }
   0xf   : > { %v227_v4 = vmul.f32 %v1008_v0, %v188_v1  ;;  %v225_v5 = vmul.f32 %v1008_v0, %v186_v2  ;;  %v228_v6 = vmul.f32 %v1008_v0, %v189_v3  ;;  %v187_v7 = vld [vmem:[%s1013_s19 + $0x8] sm:$0xff]  ;;  %v190_v10 = vld [vmem:[%s1013_s19 + $0x20] sm:$0xff]  ;;  %v193_v17 = vld [vmem:[%s1013_s19 + $0x38] sm:$0xff]  ;;  %vm784_vm14 = vcmask 982912  }
  0x10   : > { %v226_v8 = vmul.f32 %v1008_v0, %v187_v7  ;;  %v191_v9 = vld [vmem:[%s1013_s19 + $0x28] sm:$0xff]  ;;  %v229_v16 = vmul.f32 %v1008_v0, %v190_v10  ;;  %v192_v18 = vld [vmem:[%s1013_s19 + $0x30] sm:$0xff]  ;;  %v232_v21 = vmul.f32 %v1008_v0, %v193_v17  ;;  %v194_v24 = vld [vmem:[%s1013_s19 + $0x40] sm:$0xff]  ;;  %vm791_vm15 = vcmask 1048512  }
  0x11   : > { %v264_v11 = vsel %vm257_vm0, %v227_v4, 0.0  ;;  %v258_v12 = vsel %vm257_vm0, %v225_v5, 0.0  ;;  %v267_v13 = vsel %vm257_vm0, %v228_v6, 0.0  ;;  %v230_v15 = vmul.f32 %v1008_v0, %v191_v9  ;;  %v195_v23 = vld [vmem:[%s1013_s19 + $0x48] sm:$0xff]  ;;  %v197_v29 = vld [vmem:[%s1013_s19 + $0x58] sm:$0xff]  ;;  %v196_v30 = vld [vmem:[%s1013_s19 + $0x50] sm:$0xff] }
  0x12   : > { %265 = vadd.xlane.f32.xlu1 %v264_v11  ;;  %259 = vadd.xlane.f32.xlu0 %v258_v12  ;;  %v261_v14 = vsel %vm257_vm0, %v226_v8, 0.0  ;;  %v270_v20 = vsel %vm257_vm0, %v229_v16, 0.0  ;;  %v231_v22 = vmul.f32 %v1008_v0, %v192_v18  ;;  %v279_v25 = vsel %vm257_vm0, %v232_v21, 0.0  ;;  %v199_v35 = vld [vmem:[%s1013_s19 + $0x68] sm:$0xff]  ;;  %v198_v36 = vld [vmem:[%s1013_s19 + $0x60] sm:$0xff]  ;;  %v201_v41 = vld [vmem:[%s1013_s19 + $0x78] sm:$0xff] }
  0x13   : > { %v273_v19 = vsel %vm257_vm0, %v230_v15, 0.0  ;;  %v234_v27 = vmul.f32 %v1008_v0, %v195_v23  ;;  %v233_v28 = vmul.f32 %v1008_v0, %v194_v24  ;;  %v236_v33 = vmul.f32 %v1008_v0, %v197_v29  ;;  %v200_v42 = vld [vmem:[%s1013_s19 + $0x70] sm:$0xff]  ;;  %v203_v47 = vld [vmem:[%s1013_s19 + $0x88] sm:$0xff]  ;;  %v202_v48 = vld [vmem:[%s1013_s19 + $0x80] sm:$0xff] }
  0x14   : > { %v276_v26 = vsel %vm257_vm0, %v231_v22, 0.0  ;;  %v235_v34 = vmul.f32 %v1008_v0, %v196_v30  ;;  %v238_v39 = vmul.f32 %v1008_v0, %v199_v35  ;;  %v237_v40 = vmul.f32 %v1008_v0, %v198_v36  ;;  %v205_v53 = vld [vmem:[%s1013_s19 + $0x98] sm:$0xff]  ;;  %v204_v54 = vld [vmem:[%s1013_s19 + $0x90] sm:$0xff]  ;;  %v207_v59 = vld [vmem:[%s1013_s19 + $0xa8] sm:$0xff] }
  0x15   : > { %v285_v31 = vsel %vm257_vm0, %v234_v27, 0.0  ;;  %v282_v32 = vsel %vm257_vm0, %v233_v28, 0.0  ;;  %v291_v37 = vsel %vm257_vm0, %v236_v33, 0.0  ;;  %v240_v45 = vmul.f32 %v1008_v0, %v201_v41  ;;  %v206_v60 = vld [vmem:[%s1013_s19 + $0xa0] sm:$0xff]  ;;  %v209_v2 = vld [vmem:[%s1013_s19 + $0xb8] sm:$0xff]  ;;  %v208_v3 = vld [vmem:[%s1013_s19 + $0xb0] sm:$0xff] }
  0x16   : > { %268 = vadd.xlane.f32.xlu1 %v267_v13  ;;  %262 = vadd.xlane.f32.xlu0 %v261_v14  ;;  %v288_v38 = vsel %vm257_vm0, %v235_v34, 0.0  ;;  %v297_v43 = vsel %vm257_vm0, %v238_v39, 0.0  ;;  %v294_v44 = vsel %vm257_vm0, %v237_v40, 0.0  ;;  %v239_v46 = vmul.f32 %v1008_v0, %v200_v42  ;;  %v211_v8 = vld [vmem:[%s1013_s19 + $0xc8] sm:$0xff]  ;;  %v210_v9 = vld [vmem:[%s1013_s19 + $0xc0] sm:$0xff]  ;;  %v213_v14 = vld [vmem:[%s1013_s19 + $0xd8] sm:$0xff] }
  0x17   : > { %v303_v49 = vsel %vm257_vm0, %v240_v45, 0.0  ;;  %v242_v51 = vmul.f32 %v1008_v0, %v203_v47  ;;  %v241_v52 = vmul.f32 %v1008_v0, %v202_v48  ;;  %v244_v57 = vmul.f32 %v1008_v0, %v205_v53  ;;  %v212_v15 = vld [vmem:[%s1013_s19 + $0xd0] sm:$0xff]  ;;  %v214_v21 = vld [vmem:[%s1013_s19 + $0xe0] sm:$0xff] }
  0x18   : > { %v300_v50 = vsel %vm257_vm0, %v239_v46, 0.0  ;;  %v243_v58 = vmul.f32 %v1008_v0, %v204_v54  ;;  %v246_v63 = vmul.f32 %v1008_v0, %v207_v59  ;;  %v245_v1 = vmul.f32 %v1008_v0, %v206_v60  ;;  %v216_v27 = vld [vmem:[%s1013_s19 + $0xf0] sm:$0xff]  ;;  %v354_v36 = vld [vmem:[%s181_s23] sm:$0x3] }
  0x19   : > { %v309_v55 = vsel %vm257_vm0, %v242_v51, 0.0  ;;  %v306_v56 = vsel %vm257_vm0, %v241_v52, 0.0  ;;  %v315_v61 = vsel %vm257_vm0, %v244_v57, 0.0  ;;  %v248_v6 = vmul.f32 %v1008_v0, %v209_v2 }
  0x1a   : > { %274 = vadd.xlane.f32.xlu1 %v273_v19  ;;  %271 = vadd.xlane.f32.xlu0 %v270_v20  ;;  %v312_v62 = vsel %vm257_vm0, %v243_v58, 0.0  ;;  %v321_v4 = vsel %vm257_vm0, %v246_v63, 0.0  ;;  %v318_v5 = vsel %vm257_vm0, %v245_v1, 0.0  ;;  %v247_v7 = vmul.f32 %v1008_v0, %v208_v3  ;;  %v215_v20 = vld [vmem:[%s1013_s19 + $0xe8] sm:$0xff] }
  0x1b   : > { %v327_v10 = vsel %vm257_vm0, %v248_v6, 0.0  ;;  %v250_v12 = vmul.f32 %v1008_v0, %v211_v8  ;;  %v249_v13 = vmul.f32 %v1008_v0, %v210_v9  ;;  %v252_v18 = vmul.f32 %v1008_v0, %v213_v14 }
  0x1c   : > { %v324_v11 = vsel %vm257_vm0, %v247_v7, 0.0  ;;  %v251_v19 = vmul.f32 %v1008_v0, %v212_v15  ;;  %v254_v24 = vmul.f32 %v1008_v0, %v215_v20  ;;  %v356_v34 = vlaneseq }
  0x1d   : > { %v333_v16 = vsel %vm257_vm0, %v250_v12, 0.0  ;;  %v330_v17 = vsel %vm257_vm0, %v249_v13, 0.0  ;;  %v339_v22 = vsel %vm257_vm0, %v252_v18, 0.0 }
  0x1e   : > { %280 = vadd.xlane.f32.xlu1 %v279_v25  ;;  %277 = vadd.xlane.f32.xlu0 %v276_v26  ;;  %v336_v23 = vsel %vm257_vm0, %v251_v19, 0.0  ;;  %v253_v25 = vmul.f32 %v1008_v0, %v214_v21  ;;  %v217_v26 = vld [vmem:[%s1013_s19 + $0xf8] sm:$0xff]  ;;  %v345_v28 = vsel %vm257_vm0, %v254_v24, 0.0  ;;  %v1113_v35 = vshrl.u32 %v356_v34, 7 }
  0x1f   : > { %v256_v30 = vmul.f32 %v1008_v0, %v217_v26 }
  0x20   : > { %v342_v29 = vsel %vm257_vm0, %v253_v25, 0.0  ;;  %v425_v39 = vsub.s32 1, %v1113_v35 }
  0x22   : > { %286 = vadd.xlane.f32.xlu1 %v285_v31  ;;  %283 = vadd.xlane.f32.xlu0 %v282_v32  ;;  %v255_v31 = vmul.f32 %v1008_v0, %v216_v27  ;;  %v351_v32 = vsel %vm257_vm0, %v256_v30, 0.0  ;;  %v358_v0 = vsub.s32 0, %v1113_v35  ;;  %v426_v40 = vrot.slane %v354_v36, %v425_v39 }
  0x24   : > { %v348_v33 = vsel %vm257_vm0, %v255_v31, 0.0  ;;  %vm872_vm0 = vcmask 1041409  }
  0x26   : > { %292 = vadd.xlane.f32.xlu1 %v291_v37  ;;  %289 = vadd.xlane.f32.xlu0 %v288_v38  ;;  %v359_v37 = vrot.slane %v354_v36, %v358_v0  ;;  %v973_v38 = vmov 0  }
  0x27   : > { %964 = vset.pattern.permute.xlu1 %v973_v38  ;;  %963 = vset.pattern.permute.xlu0 %v973_v38 }
  0x2a   : > { %298 = vadd.xlane.f32.xlu1 %v297_v43  ;;  %295 = vadd.xlane.f32.xlu0 %v294_v44 }
  0x2e   : > { %304 = vadd.xlane.f32.xlu1 %v303_v49  ;;  %301 = vadd.xlane.f32.xlu0 %v300_v50 }
  0x32   : > { %310 = vadd.xlane.f32.xlu1 %v309_v55  ;;  %307 = vadd.xlane.f32.xlu0 %v306_v56 }
  0x36   : > { %316 = vadd.xlane.f32.xlu1 %v315_v61  ;;  %313 = vadd.xlane.f32.xlu0 %v312_v62 }
  0x3a   : > { %322 = vadd.xlane.f32.xlu1 %v321_v4  ;;  %319 = vadd.xlane.f32.xlu0 %v318_v5 }
  0x3e   : > { %328 = vadd.xlane.f32.xlu1 %v327_v10  ;;  %325 = vadd.xlane.f32.xlu0 %v324_v11 }
  0x42   : > { %334 = vadd.xlane.f32.xlu1 %v333_v16  ;;  %331 = vadd.xlane.f32.xlu0 %v330_v17 }
  0x46   : > { %340 = vadd.xlane.f32.xlu1 %v339_v22  ;;  %337 = vadd.xlane.f32.xlu0 %v336_v23 }
  0x4a   : > { %346 = vadd.xlane.f32.xlu1 %v345_v28  ;;  %343 = vadd.xlane.f32.xlu0 %v342_v29 }
  0x4e   : > { %352 = vadd.xlane.f32.xlu1 %v351_v32  ;;  %349 = vadd.xlane.f32.xlu0 %v348_v33 }
  0x5f   : > { %365 = vbcast.lane.b32.xlu1 %v359_v37, 264 }
  0x63   : > { %369 = vbcast.lane.b32.xlu1 %v359_v37, 272 }
  0x64   : > { %361 = vbcast.lane.b32.xlu0 %v359_v37, 256 }
  0x67   : > { %373 = vbcast.lane.b32.xlu1 %v359_v37, 280 }
  0x68   : > { %377 = vbcast.lane.b32.xlu0 %v359_v37, 288 }
  0x6b   : > { %381 = vbcast.lane.b32.xlu1 %v359_v37, 296 }
  0x6c   : > { %385 = vbcast.lane.b32.xlu0 %v359_v37, 304 }
  0x6f   : > { %389 = vbcast.lane.b32.xlu1 %v359_v37, 312 }
  0x70   : > { %393 = vbcast.lane.b32.xlu0 %v359_v37, 320 }
  0x73   : > { %397 = vbcast.lane.b32.xlu1 %v359_v37, 328 }
  0x74   : > { %401 = vbcast.lane.b32.xlu0 %v359_v37, 336 }
  0x77   : > { %405 = vbcast.lane.b32.xlu1 %v359_v37, 344 }
  0x78   : > { %409 = vbcast.lane.b32.xlu0 %v359_v37, 352 }
  0x7b   : > { %413 = vbcast.lane.b32.xlu1 %v359_v37, 360 }
  0x7c   : > { %417 = vbcast.lane.b32.xlu0 %v359_v37, 368 }
  0x7f   : > { %421 = vbcast.lane.b32.xlu1 %v359_v37, 376 }
  0x80   : > { %428 = vbcast.lane.b32.xlu0 %v426_v40, 256 }
  0x83   : > { %432 = vbcast.lane.b32.xlu1 %v426_v40, 264 }
  0x84   : > { %436 = vbcast.lane.b32.xlu0 %v426_v40, 272 }
  0x87   : > { %440 = vbcast.lane.b32.xlu1 %v426_v40, 280 }
  0x88   : > { %444 = vbcast.lane.b32.xlu0 %v426_v40, 288 }
  0x8b   : > { %448 = vbcast.lane.b32.xlu1 %v426_v40, 296 }
  0x8c   : > { %452 = vbcast.lane.b32.xlu0 %v426_v40, 304 }
  0x8f   : > { %456 = vbcast.lane.b32.xlu1 %v426_v40, 312 }
  0x90   : > { %460 = vbcast.lane.b32.xlu0 %v426_v40, 320 }
  0x93   : > { %464 = vbcast.lane.b32.xlu1 %v426_v40, 328 }
  0x94   : > { %468 = vbcast.lane.b32.xlu0 %v426_v40, 336 }
  0x97   : > { %472 = vbcast.lane.b32.xlu1 %v426_v40, 344 }
  0x98   : > { %476 = vbcast.lane.b32.xlu0 %v426_v40, 352 }
  0x9b   : > { %v266_v41 = vpop.xlane.xlu1 %265  ;;  %v260_v42 = vpop.xlane.xlu0 %259  ;;  %480 = vbcast.lane.b32.xlu1 %v426_v40, 360 }
  0x9c   : > { %484 = vbcast.lane.b32.xlu0 %v426_v40, 368 }
  0x9f   : > { %v269_v43 = vpop.xlane.xlu1 %268  ;;  %v263_v44 = vpop.xlane.xlu0 %262  ;;  %488 = vbcast.lane.b32.xlu1 %v426_v40, 376 }
  0xa3   : > { %v275_v45 = vpop.xlane.xlu1 %274  ;;  %v272_v46 = vpop.xlane.xlu0 %271 }
  0xa7   : > { %v281_v47 = vpop.xlane.xlu1 %280  ;;  %v278_v48 = vpop.xlane.xlu0 %277 }
  0xab   : > { %v287_v49 = vpop.xlane.xlu1 %286  ;;  %v284_v50 = vpop.xlane.xlu0 %283 }
  0xaf   : > { %v293_v51 = vpop.xlane.xlu1 %292  ;;  %v290_v52 = vpop.xlane.xlu0 %289 }
  0xb3   : > { %v1122_v53 = vpop.xlane.xlu1 %298  ;;  %v1124_v54 = vpop.xlane.xlu0 %295 }
  0xb7   : > { %v1126_v55 = vpop.xlane.xlu1 %304  ;;  %v1128_v56 = vpop.xlane.xlu0 %301 }
  0xbb   : > { %v1130_v57 = vpop.xlane.xlu1 %310  ;;  %v308_v58 = vpop.xlane.xlu0 %307 }
  0xbf   : > { %v1132_v59 = vpop.xlane.xlu1 %316  ;;  %v314_v60 = vpop.xlane.xlu0 %313 }
  0xc3   : > { %v1134_v61 = vpop.xlane.xlu1 %322  ;;  %v320_v62 = vpop.xlane.xlu0 %319 }
  0xc7   : > { %v1136_v63 = vpop.xlane.xlu1 %328  ;;  %v1138_v1 = vpop.xlane.xlu0 %325 }
  0xcb   : > { %v1140_v2 = vpop.xlane.xlu1 %334  ;;  %v1142_v3 = vpop.xlane.xlu0 %331 }
  0xcf   : > { %v1144_v4 = vpop.xlane.xlu1 %340  ;;  %v1146_v5 = vpop.xlane.xlu0 %337 }
  0xd3   : > { %v1148_v6 = vpop.xlane.xlu1 %346  ;;  %v1150_v7 = vpop.xlane.xlu0 %343 }
  0xd7   : > { %v1152_v8 = vpop.xlane.xlu1 %352  ;;  %v1154_v9 = vpop.xlane.xlu0 %349 }
  0xdb   : > { %v366_v10 = vpop.permute.xlu1 %365  ;;  %v362_v11 = vpop.permute.xlu0 %361 }
  0xdc   : > { %v523_v12 = vadd.f32 %v366_v10, %v263_v44  ;;  %v522_v13 = vadd.f32 %v362_v11, %v260_v42 }
  0xde   : > { %590 = vperm.xlu1 %964, %v523_v12   ;;  %587 = vperm.xlu0 %963, %v522_v13  }
  0xdf   : > { %v370_v14 = vpop.permute.xlu1 %369  ;;  %v378_v15 = vpop.permute.xlu0 %377 }
  0xe0   : > { %v524_v16 = vadd.f32 %v370_v14, %v266_v41  ;;  %v526_v19 = vadd.f32 %v378_v15, %v272_v46 }
  0xe2   : > { %593 = vperm.xlu1 %964, %v524_v16  }
  0xe3   : > { %v374_v17 = vpop.permute.xlu1 %373  ;;  %v386_v18 = vpop.permute.xlu0 %385 }
  0xe4   : > { %v525_v20 = vadd.f32 %v374_v17, %v269_v43  ;;  %v528_v23 = vadd.f32 %v386_v18, %v278_v48 }
  0xe6   : > { %596 = vperm.xlu0 %963, %v525_v20   ;;  %599 = vperm.xlu1 %964, %v526_v19  }
  0xe7   : > { %v382_v21 = vpop.permute.xlu1 %381  ;;  %v394_v22 = vpop.permute.xlu0 %393 }
  0xe8   : > { %v527_v24 = vadd.f32 %v382_v21, %v275_v45  ;;  %v530_v27 = vadd.f32 %v394_v22, %v284_v50 }
  0xea   : > { %602 = vperm.xlu0 %963, %v527_v24   ;;  %605 = vperm.xlu1 %964, %v528_v23  }
  0xeb   : > { %v390_v25 = vpop.permute.xlu1 %389  ;;  %v402_v26 = vpop.permute.xlu0 %401 }
  0xec   : > { %v529_v28 = vadd.f32 %v390_v25, %v281_v47  ;;  %v532_v31 = vadd.f32 %v402_v26, %v290_v52 }
  0xee   : > { %608 = vperm.xlu0 %963, %v529_v28   ;;  %611 = vperm.xlu1 %964, %v530_v27   ;;  %v1190_v28 = vand.u32 127, %v356_v34 }
  0xef   : > { %v398_v29 = vpop.permute.xlu1 %397  ;;  %v410_v30 = vpop.permute.xlu0 %409 }
  0xf0   : > { %v531_v32 = vadd.f32 %v398_v29, %v287_v49 }
  0xf2   : > { %614 = vperm.xlu0 %963, %v531_v32   ;;  %617 = vperm.xlu1 %964, %v532_v31   ;;  %v688_v31 = vadd.s32 4294967288, %v1190_v28  ;;  %v695_v32 = vadd.s32 4294967280, %v1190_v28 }
  0xf3   : > { %v406_v33 = vpop.permute.xlu1 %405  ;;  %v418_v0 = vpop.permute.xlu0 %417 }
  0xf4   : > { %v533_v36 = vadd.f32 %v406_v33, %v293_v51  ;;  %v702_v33 = vadd.s32 4294967272, %v1190_v28  ;;  %v698_v34 = vsub.s32 %v695_v32, %v1113_v35  ;;  %v765_v32 = vadd.s32 4294967200, %v1190_v28 }
  0xf6   : > { %620 = vperm.xlu0 %963, %v533_v36  }
  0xf7   : > { %v414_v37 = vpop.permute.xlu1 %413  ;;  %v429_v38 = vpop.permute.xlu0 %428 }
  0xf8   : > { %v538_v39 = vadd.f32 %v429_v38, %v308_v58  ;;  %v686_v38 = vsub.s32 %v1190_v28, %v1113_v35 }
  0xfa   : > { %635 = vperm.xlu1 %964, %v538_v39   ;;  %v709_v39 = vadd.s32 4294967264, %v1190_v28 }
  0xfb   : > { %v422_v40 = vpop.permute.xlu1 %421  ;;  %v437_v41 = vpop.permute.xlu0 %436 }
  0xfc   : > { %v540_v42 = vadd.f32 %v437_v41, %v314_v60  ;;  %v716_v41 = vadd.s32 4294967256, %v1190_v28 }
  0xfe   : > { %641 = vperm.xlu1 %964, %v540_v42  }
  0xff   : > { %v433_v43 = vpop.permute.xlu1 %432  ;;  %v445_v44 = vpop.permute.xlu0 %444 }
 0x100   : > { %v539_v45 = vadd.f32 %v433_v43, %v1130_v57  ;;  %v542_v46 = vadd.f32 %v445_v44, %v320_v62  ;;  %v723_v43 = vadd.s32 4294967248, %v1190_v28 }
 0x102   : > { %638 = vperm.xlu0 %963, %v539_v45   ;;  %647 = vperm.xlu1 %964, %v542_v46  }
 0x103   : > { %v441_v47 = vpop.permute.xlu1 %440  ;;  %v453_v48 = vpop.permute.xlu0 %452 }
 0x104   : > { %v541_v49 = vadd.f32 %v441_v47, %v1132_v59  ;;  %v544_v50 = vadd.f32 %v453_v48, %v1138_v1  ;;  %v534_v1 = vadd.f32 %v410_v30, %v1124_v54  ;;  %v537_v54 = vadd.f32 %v422_v40, %v1126_v55 }
 0x105   : > { %v705_v40 = vsub.s32 %v702_v33, %v1113_v35  ;;  %v730_v48 = vadd.s32 4294967240, %v1190_v28 }
 0x106   : > { %644 = vperm.xlu0 %963, %v541_v49   ;;  %653 = vperm.xlu1 %964, %v544_v50  }
 0x107   : > { %v449_v51 = vpop.permute.xlu1 %448  ;;  %v461_v52 = vpop.permute.xlu0 %460 }
 0x108   : > { %v543_v58 = vadd.f32 %v449_v51, %v1134_v61  ;;  %v546_v60 = vadd.f32 %v461_v52, %v1142_v3  ;;  %v535_v3 = vadd.f32 %v414_v37, %v1122_v53  ;;  %v691_v37 = vsub.s32 %v688_v31, %v1113_v35 }
 0x109   : > { %v712_v51 = vsub.s32 %v709_v39, %v1113_v35 }
 0x10a   : > { %650 = vperm.xlu0 %963, %v543_v58   ;;  %659 = vperm.xlu1 %964, %v546_v60   ;;  %v719_v58 = vsub.s32 %v716_v41, %v1113_v35 }
 0x10b   : > { %v457_v57 = vpop.permute.xlu1 %456  ;;  %v469_v62 = vpop.permute.xlu0 %468 }
 0x10c   : > { %v545_v10 = vadd.f32 %v457_v57, %v1136_v63  ;;  %v548_v11 = vadd.f32 %v469_v62, %v1146_v5  ;;  %v536_v63 = vadd.f32 %v418_v0, %v1128_v56  ;;  %v726_v62 = vsub.s32 %v723_v43, %v1113_v35 }
 0x10e   : > { %656 = vperm.xlu0 %963, %v545_v10   ;;  %665 = vperm.xlu1 %964, %v548_v11  }
 0x10f   : > { %v465_v59 = vpop.permute.xlu1 %464  ;;  %v477_v14 = vpop.permute.xlu0 %476 }
 0x110   : > { %v547_v12 = vadd.f32 %v465_v59, %v1140_v2  ;;  %v550_v5 = vadd.f32 %v477_v14, %v1150_v7  ;;  %v744_v14 = vadd.s32 4294967224, %v1190_v28 }
 0x112   : > { %662 = vperm.xlu0 %963, %v547_v12   ;;  %623 = vperm.xlu1 %964, %v534_v1   ;;  %v737_v12 = vadd.s32 4294967232, %v1190_v28 }
 0x113   : > { %v473_v61 = vpop.permute.xlu1 %472  ;;  %v485_v16 = vpop.permute.xlu0 %484 }
 0x114   : > { %v549_v13 = vadd.f32 %v473_v61, %v1144_v4  ;;  %v552_v53 = vadd.f32 %v485_v16, %v1154_v9  ;;  %v733_v61 = vsub.s32 %v730_v48, %v1113_v35  ;;  %v751_v16 = vadd.s32 4294967216, %v1190_v28 }
 0x116   : > { %668 = vperm.xlu0 %963, %v549_v13   ;;  %626 = vperm.xlu1 %964, %v535_v3  }
 0x117   : > { %v481_v15 = vpop.permute.xlu1 %480 }
 0x118   : > { %v551_v2 = vadd.f32 %v481_v15, %v1148_v6 }
 0x11a   : > { %629 = vperm.xlu1 %964, %v536_v63   ;;  %671 = vperm.xlu0 %963, %v550_v5  }
 0x11b   : > { %v489_v4 = vpop.permute.xlu1 %488 }
 0x11c   : > { %v553_v17 = vadd.f32 %v489_v4, %v1152_v8 }
 0x11e   : > { %632 = vperm.xlu1 %964, %v537_v54   ;;  %674 = vperm.xlu0 %963, %v551_v2  }
 0x122   : > { %677 = vperm.xlu0 %963, %v552_v53  }
 0x126   : > { %680 = vperm.xlu0 %963, %v553_v17  }
 0x159   : > { %v591_v56 = vpop.permute.xlu1 %590  ;;  %v588_v18 = vpop.permute.xlu0 %587 }
 0x15a   : > { %v692_v46 = vrot.slane %v591_v56, %v691_v37  ;;  %v687_v47 = vrot.slane %v588_v18, %v686_v38  ;;  %v740_v56 = vsub.s32 %v737_v12, %v1113_v35  ;;  %v758_v18 = vadd.s32 4294967208, %v1190_v28 }
 0x15c   : > { %v694_v1 = vsel %vm693_vm1, %v692_v46, %v687_v47  ;;  %v761_v33 = vsub.s32 %v758_v18, %v1113_v35  ;;  %v768_v46 = vsub.s32 %v765_v32, %v1113_v35 }
 0x15d   : > { %v594_v7 = vpop.permute.xlu1 %593 }
 0x15e   : > { %v699_v50 = vrot.slane %v594_v7, %v698_v34 }
 0x160   : > { %v701_v3 = vsel %vm700_vm2, %v699_v50, %v694_v1 }
 0x161   : > { %v1173_v19 = vpop.permute.xlu1 %599  ;;  %v597_v20 = vpop.permute.xlu0 %596 }
 0x162   : > { %v706_v52 = vrot.slane %v597_v20, %v705_v40  ;;  %v713_v13 = vrot.slane %v1173_v19, %v712_v51  ;;  %v747_v20 = vsub.s32 %v744_v14, %v1113_v35 }
 0x164   : > { %v708_v5 = vsel %vm707_vm3, %v706_v52, %v701_v3 }
 0x165   : > { %v1175_v21 = vpop.permute.xlu1 %605  ;;  %v1177_v55 = vpop.permute.xlu0 %602  ;;  %v715_v19 = vsel %vm714_vm4, %v713_v13, %v708_v5 }
 0x166   : > { %v720_v15 = vrot.slane %v1177_v55, %v719_v58  ;;  %v727_v7 = vrot.slane %v1175_v21, %v726_v62 }
 0x169   : > { %v1179_v6 = vpop.permute.xlu1 %611  ;;  %v1181_v22 = vpop.permute.xlu0 %608 }
 0x16d   : > { %v1183_v9 = vpop.permute.xlu1 %617  ;;  %v1185_v23 = vpop.permute.xlu0 %614 }
 0x16e   : > { %v748_v41 = vrot.slane %v1185_v23, %v747_v20 }
 0x171   : > { %v1187_v24 = vpop.permute.xlu0 %620 }
 0x172   : > { %v762_v52 = vrot.slane %v1187_v24, %v761_v33 }
 0x175   : > { %v636_v8 = vpop.permute.xlu1 %635 }
 0x176   : > { %v796_v49 = vrot.slane %v636_v8, %v686_v38  ;;  %v722_v8 = vsel %vm721_vm5, %v720_v15, %v715_v19 }
 0x177   : > { %v729_v38 = vsel %vm728_vm6, %v727_v7, %v722_v8 }
 0x179   : > { %v642_v25 = vpop.permute.xlu1 %641 }
 0x17a   : > { %v805_v10 = vrot.slane %v642_v25, %v698_v34  ;;  %v734_v25 = vrot.slane %v1181_v22, %v733_v61  ;;  %v741_v22 = vrot.slane %v1179_v6, %v740_v56 }
 0x17d   : > { %v648_v26 = vpop.permute.xlu1 %647  ;;  %v639_v27 = vpop.permute.xlu0 %638 }
 0x17e   : > { %v800_v42 = vrot.slane %v639_v27, %v691_v37  ;;  %v815_v53 = vrot.slane %v648_v26, %v712_v51  ;;  %v779_v37 = vadd.s32 4294967184, %v1190_v28 }
 0x180   : > { %v801_v60 = vsel %vm693_vm1, %v800_v42, %v796_v49  ;;  %v782_v48 = vsub.s32 %v779_v37, %v1113_v35 }
 0x181   : > { %v1192_v29 = vpop.permute.xlu1 %653  ;;  %v645_v30 = vpop.permute.xlu0 %644  ;;  %v806_v63 = vsel %vm700_vm2, %v805_v10, %v801_v60 }
 0x182   : > { %v810_v57 = vrot.slane %v645_v30, %v705_v40  ;;  %v754_v30 = vsub.s32 %v751_v16, %v1113_v35  ;;  %v825_v31 = vrot.slane %v1192_v29, %v726_v62  ;;  %v786_v40 = vadd.s32 4294967176, %v1190_v28 }
 0x183   : > { %v736_v29 = vsel %vm735_vm7, %v734_v25, %v729_v38 }
 0x184   : > { %v811_v54 = vsel %vm707_vm3, %v810_v57, %v806_v63  ;;  %v743_v49 = vsel %vm742_vm8, %v741_v22, %v736_v29  ;;  %v789_v50 = vsub.s32 %v786_v40, %v1113_v35 }
 0x185   : > { %v1197_v0 = vpop.permute.xlu1 %659  ;;  %v651_v36 = vpop.permute.xlu0 %650  ;;  %v816_v55 = vsel %vm714_vm4, %v815_v53, %v811_v54  ;;  %v750_v51 = vsel %vm749_vm9, %v748_v41, %v743_v49 }
 0x186   : > { %v820_v2 = vrot.slane %v651_v36, %v719_v58  ;;  %v772_v36 = vadd.s32 4294967192, %v1190_v28  ;;  %v755_v28 = vrot.slane %v1183_v9, %v754_v30 }
 0x188   : > { %v821_v26 = vsel %vm721_vm5, %v820_v2, %v816_v55  ;;  %v775_v47 = vsub.s32 %v772_v36, %v1113_v35  ;;  %v757_v35 = vsel %vm756_vm10, %v755_v28, %v750_v51 }
 0x189   : > { %v1207_v44 = vpop.permute.xlu1 %665  ;;  %v1209_v45 = vpop.permute.xlu0 %656  ;;  %v826_v34 = vsel %vm728_vm6, %v825_v31, %v821_v26  ;;  %v764_v3 = vsel %vm763_vm11, %v762_v52, %v757_v35 }
 0x18a   : > { %v830_v27 = vrot.slane %v1209_v45, %v733_v61  ;;  %v835_v45 = vrot.slane %v1197_v0, %v740_v56  ;;  %v845_v60 = vrot.slane %v1207_v44, %v754_v30 }
 0x18c   : > { %v831_v42 = vsel %vm735_vm7, %v830_v27, %v826_v34 }
 0x18d   : > { %v1215_v11 = vpop.permute.xlu1 %623  ;;  %v663_v59 = vpop.permute.xlu0 %662  ;;  %v836_v23 = vsel %vm742_vm8, %v835_v45, %v831_v42 }
 0x18e   : > { %v840_v43 = vrot.slane %v663_v59, %v747_v20  ;;  %v769_v57 = vrot.slane %v1215_v11, %v768_v46 }
 0x190   : > { %v841_v0 = vsel %vm749_vm9, %v840_v43, %v836_v23  ;;  %v771_v11 = vsel %vm770_vm12, %v769_v57, %v764_v3 }
 0x191   : > { %v1225_v4 = vpop.permute.xlu1 %626  ;;  %v669_v17 = vpop.permute.xlu0 %668  ;;  %v846_v12 = vsel %vm756_vm10, %v845_v60, %v841_v0 }
 0x192   : > { %v850_v58 = vrot.slane %v669_v17, %v761_v33  ;;  %v776_v9 = vrot.slane %v1225_v4, %v775_v47 }
 0x194   : > { %v851_v13 = vsel %vm763_vm11, %v850_v58, %v846_v12  ;;  %v778_v5 = vsel %vm777_vm13, %v776_v9, %v771_v11 }
 0x195   : > { %v672_v21 = vpop.permute.xlu0 %671  ;;  %v630_v39 = vpop.permute.xlu1 %629 }
 0x196   : > { %v855_v62 = vrot.slane %v672_v21, %v768_v46  ;;  %v783_v24 = vrot.slane %v630_v39, %v782_v48 }
 0x198   : > { %v856_v14 = vsel %vm770_vm12, %v855_v62, %v851_v13  ;;  %v785_v2 = vsel %vm784_vm14, %v783_v24, %v778_v5 }
 0x199   : > { %v675_v6 = vpop.permute.xlu0 %674  ;;  %v633_v10 = vpop.permute.xlu1 %632 }
 0x19a   : > { %v860_v1 = vrot.slane %v675_v6, %v775_v47  ;;  %v790_v44 = vrot.slane %v633_v10, %v789_v50 }
 0x19c   : > { %v861_v15 = vsel %vm777_vm13, %v860_v1, %v856_v14  ;;  %v792_v53 = vsel %vm791_vm15, %v790_v44, %v785_v2 }
 0x19d   : > { %v678_v59 = vpop.permute.xlu0 %677 }
 0x19e   : > { %v865_v61 = vrot.slane %v678_v59, %v782_v48 }
 0x1a0   : > { %v866_v16 = vsel %vm784_vm14, %v865_v61, %v861_v15 }
 0x1a1   : > { %v681_v63 = vpop.permute.xlu0 %680 }
 0x1a2   : > { %v870_v54 = vrot.slane %v681_v63, %v789_v50 }
 0x1a4   : > { %v871_v4 = vsel %vm791_vm15, %v870_v54, %v866_v16 }
 0x1a5   : > { %v873_v17 = vsel %vm872_vm0, %v871_v4, %v792_v53 }
 0x1a6   : > { %875 = vst [vmem:[%s185_s26] sm:$0x3] %v873_v17 }
 0x1a7 PF: > { %s13_s12 = sadd.s32 1, %s971_s12  }
 0x1a8   : > { %p10_p4 = scmp.ge.s32.totalorder %s13_s12, 4  }
 0x1aa   :  { %12 = sbr.rel (!%p10_p4) target bundleno = 1 (0x1), region = 65 }

</bundles_post_ra>
